<compile_context>
chip_gen: v7x
topology: tpu7x:2x2x1
jax: 0.10.0
libtpu: 0.0.40
codegen_flags: <defaults>
</compile_context>

<pallas_src>
import functools

import jax
import jax.numpy as jnp
from jax.experimental import pallas as pl
from jax.experimental.pallas import tpu as pltpu


def _round_up(n, m):
    return ((n + m - 1) // m) * m


def _coupling_kernel(x1_ref, x2_ref,
                     w01_ref, w2_ref, w3_ref, w4_ref, w5_ref, w6_ref,
                     bh_ref, b6_ref,
                     y2_ref):
    """y2 = x2 + MLP(x1) for one (TILE_B, L) batch tile, fully in VMEM.

    bf16 matmul operands, f32 MXU accumulation, f32 residual add.
    """
    f32 = jnp.float32
    bf16 = jnp.bfloat16

    x1 = x1_ref[...]                                             # (TILE_B, L) bf16
    # Fused Linear0+Linear1 (w01 = w0 @ w1, b01 = b0 @ w1 + b1), then ReLU.
    h = jnp.dot(x1, w01_ref[...], preferred_element_type=f32) + bh_ref[0:1, :]
    h = jnp.maximum(h, 0.0)
    # Four hidden Linear + ReLU blocks.
    for i, w_ref in enumerate((w2_ref, w3_ref, w4_ref, w5_ref)):
        h = jnp.dot(h.astype(bf16), w_ref[...],
                    preferred_element_type=f32) + bh_ref[i + 1:i + 2, :]
        h = jnp.maximum(h, 0.0)
    # Final projection back to latent size (no activation).
    t = jnp.dot(h.astype(bf16), w6_ref[...],
                preferred_element_type=f32) + b6_ref[...]
    # Additive coupling law in f32.
    y2_ref[...] = x2_ref[...] + t


@functools.partial(jax.jit, static_argnames=("partition",))
def additive_coupling_forward(x, weights, biases, partition="even"):
    """x: (B, 2*L) float. weights[i]: (in_i, out_i), biases[i]: (1, out_i)."""
    x = x.astype(jnp.float32)
    B, D = x.shape
    L = D // 2
    H = weights[1].shape[0]

    # Even/odd column split (thin XLA glue around the kernel).
    if partition == "even":
        x1, x2 = x[:, 0::2], x[:, 1::2]
    else:
        x1, x2 = x[:, 1::2], x[:, 0::2]

    w0, w1, w2, w3, w4, w5, w6 = weights
    b0, b1, b2, b3, b4, b5, b6 = biases

    # Algebraic fusion of the first two Linears (no ReLU between them).
    w01 = w0 @ w1
    b01 = b0 @ w1 + b1

    bf16 = jnp.bfloat16
    w01b, w2b, w3b, w4b, w5b, w6b = (w.astype(bf16)
                                     for w in (w01, w2, w3, w4, w5, w6))
    bh = jnp.concatenate([b01, b2, b3, b4, b5], axis=0).astype(jnp.float32)
    b6f = b6.astype(jnp.float32)
    x1b = x1.astype(bf16)

    # Batch tiling: multiple of 8 sublanes, up to 256 rows per tile.
    TILE_B = min(256, _round_up(max(B, 1), 8))
    num_tiles = pl.cdiv(B, TILE_B)
    B_pad = num_tiles * TILE_B
    x2p = x2
    if B_pad != B:
        x1b = jnp.pad(x1b, ((0, B_pad - B), (0, 0)))
        x2p = jnp.pad(x2, ((0, B_pad - B), (0, 0)))

    act_spec = pl.BlockSpec((TILE_B, L), lambda i: (i, 0))
    out_spec = pl.BlockSpec((TILE_B, L), lambda i: (i, 0))

    def const_spec(shape):
        # Resident operand: same block at every grid step -> fetched once.
        return pl.BlockSpec(shape, lambda i: (0,) * len(shape))

    operands = (x1b, x2p, w01b, w2b, w3b, w4b, w5b, w6b, bh, b6f)
    in_specs = [act_spec, act_spec] + [const_spec(a.shape) for a in operands[2:]]

    # Cost model + explicit VMEM budget (resident weights + pipelined tiles).
    flops = 2 * B_pad * (2 * L * H + 4 * H * H)
    bytes_accessed = int(sum(int(a.size) * a.dtype.itemsize for a in operands)
                         + B_pad * L * 4)
    resident_bytes = int(sum(int(a.size) * a.dtype.itemsize
                             for a in operands[2:]))
    act_tile_bytes = TILE_B * L * (2 + 4 + 4)        # bf16 x1 + f32 x2 + f32 y2
    vmem_limit = min(100 * 1024 * 1024,
                     max(4 * 1024 * 1024,
                         2 * resident_bytes + 4 * act_tile_bytes + (2 << 20)))

    y2 = pl.pallas_call(
        _coupling_kernel,
        grid_spec=pltpu.PrefetchScalarGridSpec(
            num_scalar_prefetch=0,
            grid=(num_tiles,),
            in_specs=in_specs,
            out_specs=out_spec),
        out_shape=jax.ShapeDtypeStruct((B_pad, L), jnp.float32),
        compiler_params=pltpu.CompilerParams(
            dimension_semantics=("parallel",),
            vmem_limit_bytes=int(vmem_limit)),
        cost_estimate=pl.CostEstimate(flops=int(flops), transcendentals=0,
                                      bytes_accessed=bytes_accessed),
    )(*operands)

    y2 = y2[:B]
    y1 = x1
    # Re-interleave columns (single fused XLA pass).
    if partition == "even":
        return jnp.stack([y1, y2], axis=-1).reshape(B, D)
    return jnp.stack([y2, y1], axis=-1).reshape(B, D)


def make_params(key, latent_dim, hidden_dim):
    """Deterministic synthetic init of the 7 Linear layers (stored as (in, out))."""
    dims = [(latent_dim, hidden_dim)] + [(hidden_dim, hidden_dim)] * 5 + \
           [(hidden_dim, latent_dim)]
    weights, biases = [], []
    for (din, dout) in dims:
        key, kw, kb = jax.random.split(key, 3)
        bound = 1.0 / jnp.sqrt(din)
        weights.append(jax.random.uniform(kw, (din, dout), jnp.float32,
                                          minval=-bound, maxval=bound))
        biases.append(jax.random.uniform(kb, (1, dout), jnp.float32,
                                         minval=-bound, maxval=bound))
    return tuple(weights), tuple(biases)


def reference_forward(x, weights, biases, partition="even"):
    """Pure-JAX f32 reference mirroring the PyTorch module."""
    x = x.astype(jnp.float32)
    B, D = x.shape
    if partition == "even":
        x1, x2 = x[:, 0::2], x[:, 1::2]
    else:
        x1, x2 = x[:, 1::2], x[:, 0::2]
    h = x1 @ weights[0] + biases[0]
    h = h @ weights[1] + biases[1]
    for i in range(2, 6):
        h = jnp.maximum(h, 0.0)
        h = h @ weights[i] + biases[i]
    h = jnp.maximum(h, 0.0)
    t = h @ weights[6] + biases[6]
    y2 = x2 + t
    y1 = x1
    if partition == "even":
        return jnp.stack([y1, y2], axis=-1).reshape(B, D)
    return jnp.stack([y2, y1], axis=-1).reshape(B, D)


if __name__ == "__main__":
    key = jax.random.PRNGKey(0)
    batch, latent_dim, hidden_dim = 2, 4, 32

    kx, kp = jax.random.split(key)
    x = jax.random.normal(kx, (batch, 2 * latent_dim), jnp.float32)
    weights, biases = make_params(kp, latent_dim, hidden_dim)

    y = additive_coupling_forward(x, weights, biases, partition="even")
    y = jax.block_until_ready(y)

    y_ref = reference_forward(x, weights, biases, partition="even")
    assert y.shape == (batch, 2 * latent_dim)
    # bf16 matmul operands with f32 accumulation -> small tolerance vs f32 ref.
    assert jnp.allclose(y, y_ref, atol=5e-2, rtol=5e-2), "mismatch vs reference"

    print("KERNEL_OK")
</pallas_src>

<mosaic_0001>
module attributes {stable_mosaic.version = 11 : i64} {
  func.func @_coupling_kernel(%arg0: i32, %arg1: memref<8x4xbf16, #tpu.memory_space<vmem>>, %arg2: memref<8x4xf32, #tpu.memory_space<vmem>>, %arg3: memref<4x32xbf16, #tpu.memory_space<vmem>>, %arg4: memref<32x32xbf16, #tpu.memory_space<vmem>>, %arg5: memref<32x32xbf16, #tpu.memory_space<vmem>>, %arg6: memref<32x32xbf16, #tpu.memory_space<vmem>>, %arg7: memref<32x32xbf16, #tpu.memory_space<vmem>>, %arg8: memref<32x4xbf16, #tpu.memory_space<vmem>>, %arg9: memref<5x32xf32, #tpu.memory_space<vmem>>, %arg10: memref<1x4xf32, #tpu.memory_space<vmem>>, %arg11: memref<8x4xf32, #tpu.memory_space<vmem>>) attributes {dimension_semantics = [#tpu.dimension_semantics<parallel>], iteration_bounds = array<i64: 1>, scalar_prefetch = 0 : i64, scratch_operands = 0 : i64, tpu.core_type = #tpu.core_type<tc>, window_params = [{transform_indices = @transform_0, window_bounds = array<i64: 8, 4>}, {transform_indices = @transform_1, window_bounds = array<i64: 8, 4>}, {pipeline_mode = #tpu.pipeline_mode<synchronous>, transform_indices = @transform_2, window_bounds = array<i64: 4, 32>}, {pipeline_mode = #tpu.pipeline_mode<synchronous>, transform_indices = @transform_3, window_bounds = array<i64: 32, 32>}, {pipeline_mode = #tpu.pipeline_mode<synchronous>, transform_indices = @transform_4, window_bounds = array<i64: 32, 32>}, {pipeline_mode = #tpu.pipeline_mode<synchronous>, transform_indices = @transform_5, window_bounds = array<i64: 32, 32>}, {pipeline_mode = #tpu.pipeline_mode<synchronous>, transform_indices = @transform_6, window_bounds = array<i64: 32, 32>}, {pipeline_mode = #tpu.pipeline_mode<synchronous>, transform_indices = @transform_7, window_bounds = array<i64: 32, 4>}, {pipeline_mode = #tpu.pipeline_mode<synchronous>, transform_indices = @transform_8, window_bounds = array<i64: 5, 32>}, {pipeline_mode = #tpu.pipeline_mode<synchronous>, transform_indices = @transform_9, window_bounds = array<i64: 1, 4>}, {transform_indices = @transform_10, window_bounds = array<i64: 8, 4>}]} {
    %c0 = arith.constant 0 : index
    %c0_0 = arith.constant 0 : index
    %0 = vector.load %arg1[%c0, %c0_0] : memref<8x4xbf16, #tpu.memory_space<vmem>>, vector<8x4xbf16>
    %c0_1 = arith.constant 0 : index
    %c0_2 = arith.constant 0 : index
    %1 = vector.load %arg3[%c0_1, %c0_2] : memref<4x32xbf16, #tpu.memory_space<vmem>>, vector<4x32xbf16>
    %cst = arith.constant dense<0.000000e+00> : vector<8x32xf32>
    %2 = tpu.matmul %0, %1, %cst {dimension_numbers = #tpu.dot_dimension_numbers<[1], [0], [0], [1], [0, 0, 1, 1], [], []>} : vector<8x4xbf16>, vector<4x32xbf16>, vector<8x32xf32> -> vector<8x32xf32>
    %c0_3 = arith.constant 0 : index
    %c0_4 = arith.constant 0 : index
    %3 = vector.load %arg9[%c0_3, %c0_4] : memref<5x32xf32, #tpu.memory_space<vmem>>, vector<1x32xf32>
    %4 = vector.broadcast %3 : vector<1x32xf32> to vector<8x32xf32>
    %5 = arith.addf %2, %4 : vector<8x32xf32>
    %cst_5 = arith.constant 0.000000e+00 : f32
    %6 = vector.broadcast %cst_5 : f32 to vector<8x32xf32>
    %7 = arith.maximumf %5, %6 : vector<8x32xf32>
    %8 = arith.truncf %7 : vector<8x32xf32> to vector<8x32xbf16>
    %c0_6 = arith.constant 0 : index
    %c0_7 = arith.constant 0 : index
    %9 = vector.load %arg4[%c0_6, %c0_7] : memref<32x32xbf16, #tpu.memory_space<vmem>>, vector<32x32xbf16>
    %cst_8 = arith.constant dense<0.000000e+00> : vector<8x32xf32>
    %10 = tpu.matmul %8, %9, %cst_8 {dimension_numbers = #tpu.dot_dimension_numbers<[1], [0], [0], [1], [0, 0, 1, 1], [], []>} : vector<8x32xbf16>, vector<32x32xbf16>, vector<8x32xf32> -> vector<8x32xf32>
    %c1 = arith.constant 1 : index
    %c0_9 = arith.constant 0 : index
    %11 = vector.load %arg9[%c1, %c0_9] : memref<5x32xf32, #tpu.memory_space<vmem>>, vector<1x32xf32>
    %12 = vector.broadcast %11 : vector<1x32xf32> to vector<8x32xf32>
    %13 = arith.addf %10, %12 : vector<8x32xf32>
    %cst_10 = arith.constant 0.000000e+00 : f32
    %14 = vector.broadcast %cst_10 : f32 to vector<8x32xf32>
    %15 = arith.maximumf %13, %14 : vector<8x32xf32>
    %16 = arith.truncf %15 : vector<8x32xf32> to vector<8x32xbf16>
    %c0_11 = arith.constant 0 : index
    %c0_12 = arith.constant 0 : index
    %17 = vector.load %arg5[%c0_11, %c0_12] : memref<32x32xbf16, #tpu.memory_space<vmem>>, vector<32x32xbf16>
    %cst_13 = arith.constant dense<0.000000e+00> : vector<8x32xf32>
    %18 = tpu.matmul %16, %17, %cst_13 {dimension_numbers = #tpu.dot_dimension_numbers<[1], [0], [0], [1], [0, 0, 1, 1], [], []>} : vector<8x32xbf16>, vector<32x32xbf16>, vector<8x32xf32> -> vector<8x32xf32>
    %c2 = arith.constant 2 : index
    %c0_14 = arith.constant 0 : index
    %19 = vector.load %arg9[%c2, %c0_14] : memref<5x32xf32, #tpu.memory_space<vmem>>, vector<1x32xf32>
    %20 = vector.broadcast %19 : vector<1x32xf32> to vector<8x32xf32>
    %21 = arith.addf %18, %20 : vector<8x32xf32>
    %cst_15 = arith.constant 0.000000e+00 : f32
    %22 = vector.broadcast %cst_15 : f32 to vector<8x32xf32>
    %23 = arith.maximumf %21, %22 : vector<8x32xf32>
    %24 = arith.truncf %23 : vector<8x32xf32> to vector<8x32xbf16>
    %c0_16 = arith.constant 0 : index
    %c0_17 = arith.constant 0 : index
    %25 = vector.load %arg6[%c0_16, %c0_17] : memref<32x32xbf16, #tpu.memory_space<vmem>>, vector<32x32xbf16>
    %cst_18 = arith.constant dense<0.000000e+00> : vector<8x32xf32>
    %26 = tpu.matmul %24, %25, %cst_18 {dimension_numbers = #tpu.dot_dimension_numbers<[1], [0], [0], [1], [0, 0, 1, 1], [], []>} : vector<8x32xbf16>, vector<32x32xbf16>, vector<8x32xf32> -> vector<8x32xf32>
    %c3 = arith.constant 3 : index
    %c0_19 = arith.constant 0 : index
    %27 = vector.load %arg9[%c3, %c0_19] : memref<5x32xf32, #tpu.memory_space<vmem>>, vector<1x32xf32>
    %28 = vector.broadcast %27 : vector<1x32xf32> to vector<8x32xf32>
    %29 = arith.addf %26, %28 : vector<8x32xf32>
    %cst_20 = arith.constant 0.000000e+00 : f32
    %30 = vector.broadcast %cst_20 : f32 to vector<8x32xf32>
    %31 = arith.maximumf %29, %30 : vector<8x32xf32>
    %32 = arith.truncf %31 : vector<8x32xf32> to vector<8x32xbf16>
    %c0_21 = arith.constant 0 : index
    %c0_22 = arith.constant 0 : index
    %33 = vector.load %arg7[%c0_21, %c0_22] : memref<32x32xbf16, #tpu.memory_space<vmem>>, vector<32x32xbf16>
    %cst_23 = arith.constant dense<0.000000e+00> : vector<8x32xf32>
    %34 = tpu.matmul %32, %33, %cst_23 {dimension_numbers = #tpu.dot_dimension_numbers<[1], [0], [0], [1], [0, 0, 1, 1], [], []>} : vector<8x32xbf16>, vector<32x32xbf16>, vector<8x32xf32> -> vector<8x32xf32>
    %c4 = arith.constant 4 : index
    %c0_24 = arith.constant 0 : index
    %35 = vector.load %arg9[%c4, %c0_24] : memref<5x32xf32, #tpu.memory_space<vmem>>, vector<1x32xf32>
    %36 = vector.broadcast %35 : vector<1x32xf32> to vector<8x32xf32>
    %37 = arith.addf %34, %36 : vector<8x32xf32>
    %cst_25 = arith.constant 0.000000e+00 : f32
    %38 = vector.broadcast %cst_25 : f32 to vector<8x32xf32>
    %39 = arith.maximumf %37, %38 : vector<8x32xf32>
    %40 = arith.truncf %39 : vector<8x32xf32> to vector<8x32xbf16>
    %c0_26 = arith.constant 0 : index
    %c0_27 = arith.constant 0 : index
    %41 = vector.load %arg8[%c0_26, %c0_27] : memref<32x4xbf16, #tpu.memory_space<vmem>>, vector<32x4xbf16>
    %cst_28 = arith.constant dense<0.000000e+00> : vector<8x4xf32>
    %42 = tpu.matmul %40, %41, %cst_28 {dimension_numbers = #tpu.dot_dimension_numbers<[1], [0], [0], [1], [0, 0, 1, 1], [], []>} : vector<8x32xbf16>, vector<32x4xbf16>, vector<8x4xf32> -> vector<8x4xf32>
    %c0_29 = arith.constant 0 : index
    %c0_30 = arith.constant 0 : index
    %43 = vector.load %arg10[%c0_29, %c0_30] : memref<1x4xf32, #tpu.memory_space<vmem>>, vector<1x4xf32>
    %44 = vector.broadcast %43 : vector<1x4xf32> to vector<8x4xf32>
    %45 = arith.addf %42, %44 : vector<8x4xf32>
    %c0_31 = arith.constant 0 : index
    %c0_32 = arith.constant 0 : index
    %46 = vector.load %arg2[%c0_31, %c0_32] : memref<8x4xf32, #tpu.memory_space<vmem>>, vector<8x4xf32>
    %47 = arith.addf %46, %45 : vector<8x4xf32>
    %c0_33 = arith.constant 0 : index
    %c0_34 = arith.constant 0 : index
    %48 = vector.load %arg11[%c0_33, %c0_34] : memref<8x4xf32, #tpu.memory_space<vmem>>, vector<8x4xf32>
    tpu.vector_store %arg11[%c0_33, %c0_34], %47 {strides = array<i32>} : memref<8x4xf32, #tpu.memory_space<vmem>>, vector<8x4xf32>,
    return
  }
  func.func @transform_0(%arg0: i32) -> (i32, i32) {
    %c0_i32 = arith.constant 0 : i32
    %c0_i32_0 = arith.constant 0 : i32
    return %arg0, %c0_i32 : i32, i32
  }
  func.func @transform_1(%arg0: i32) -> (i32, i32) {
    %c0_i32 = arith.constant 0 : i32
    %c0_i32_0 = arith.constant 0 : i32
    return %arg0, %c0_i32 : i32, i32
  }
  func.func @transform_2(%arg0: i32) -> (i32, i32) {
    %c0_i32 = arith.constant 0 : i32
    %c0_i32_0 = arith.constant 0 : i32
    %c0_i32_1 = arith.constant 0 : i32
    return %c0_i32, %c0_i32_0 : i32, i32
  }
  func.func @transform_3(%arg0: i32) -> (i32, i32) {
    %c0_i32 = arith.constant 0 : i32
    %c0_i32_0 = arith.constant 0 : i32
    %c0_i32_1 = arith.constant 0 : i32
    return %c0_i32, %c0_i32_0 : i32, i32
  }
  func.func @transform_4(%arg0: i32) -> (i32, i32) {
    %c0_i32 = arith.constant 0 : i32
    %c0_i32_0 = arith.constant 0 : i32
    %c0_i32_1 = arith.constant 0 : i32
    return %c0_i32, %c0_i32_0 : i32, i32
  }
  func.func @transform_5(%arg0: i32) -> (i32, i32) {
    %c0_i32 = arith.constant 0 : i32
    %c0_i32_0 = arith.constant 0 : i32
    %c0_i32_1 = arith.constant 0 : i32
    return %c0_i32, %c0_i32_0 : i32, i32
  }
  func.func @transform_6(%arg0: i32) -> (i32, i32) {
    %c0_i32 = arith.constant 0 : i32
    %c0_i32_0 = arith.constant 0 : i32
    %c0_i32_1 = arith.constant 0 : i32
    return %c0_i32, %c0_i32_0 : i32, i32
  }
  func.func @transform_7(%arg0: i32) -> (i32, i32) {
    %c0_i32 = arith.constant 0 : i32
    %c0_i32_0 = arith.constant 0 : i32
    %c0_i32_1 = arith.constant 0 : i32
    return %c0_i32, %c0_i32_0 : i32, i32
  }
  func.func @transform_8(%arg0: i32) -> (i32, i32) {
    %c0_i32 = arith.constant 0 : i32
    %c0_i32_0 = arith.constant 0 : i32
    %c0_i32_1 = arith.constant 0 : i32
    return %c0_i32, %c0_i32_0 : i32, i32
  }
  func.func @transform_9(%arg0: i32) -> (i32, i32) {
    %c0_i32 = arith.constant 0 : i32
    %c0_i32_0 = arith.constant 0 : i32
    %c0_i32_1 = arith.constant 0 : i32
    return %c0_i32, %c0_i32_0 : i32, i32
  }
  func.func @transform_10(%arg0: i32) -> (i32, i32) {
    %c0_i32 = arith.constant 0 : i32
    %c0_i32_0 = arith.constant 0 : i32
    return %arg0, %c0_i32 : i32, i32
  }
}

</mosaic_0001>

<bundles_post_ra>
// kernel: additive_coupling_forward.1
= control target key start
LH: loop header
LB: loop body
LE: loop exit
PB: predicated region body
PF: predicated region fallthrough
CT: control target
= control target key end

     0   :  { %vm47_vm0 = vcmask 1041408   ;;  %v528_v0 = vmov 0.0   ;;  %vm529_vm1 = vmmov 0   ;;  %vm43_vm2 = vcmask 31744   ;;  %s675_s2 = inlined_call_operand.vmem [shape: bf16[4,32], index: 2, kind: input, shape index: {}]   ;;  %s676_s0 = inlined_call_operand.vmem [shape: bf16[8,4], index: 0, kind: input, shape index: {}]   ;;  %s677_s3 = inlined_call_operand.vmem [shape: bf16[32,32], index: 3, kind: input, shape index: {}]   ;;  %s678_s4 = inlined_call_operand.vmem [shape: bf16[32,32], index: 4, kind: input, shape index: {}]   ;;  %s679_s8 = inlined_call_operand.vmem [shape: f32[5,32], index: 8, kind: input, shape index: {}]   ;;  %s680_s5 = inlined_call_operand.vmem [shape: bf16[32,32], index: 5, kind: input, shape index: {}]   ;;  %s681_s6 = inlined_call_operand.vmem [shape: bf16[32,32], index: 6, kind: input, shape index: {}]   ;;  %s682_s7 = inlined_call_operand.vmem [shape: bf16[32,4], index: 7, kind: input, shape index: {}]   ;;  %s683_s9 = inlined_call_operand.vmem [shape: f32[1,4], index: 9, kind: input, shape index: {}]   ;;  %s684_s1 = inlined_call_operand.vmem [shape: f32[8,4], index: 1, kind: input, shape index: {}]   ;;  %s685_s10 = inlined_call_operand.vmem [shape: f32[8,4], index: 10, kind: output, shape index: {}]  }
   0x1   :  { %470 = vmatprep.subr.bf16.mxu0 %v528_v0  ;;  %v37_v1 = vld [vmem:[%s675_s2] sm:$0x3]  ;;  %472 = vmatprep.mubr.msk.bf16.mxu0 %vm529_vm1, %v528_v0  ;;  %v519_v5 = vld [vmem:[%s677_s3 + $0x8] sm:$0xff]   ;;  %vm114_vm3 = vcmask 261120   ;;  %v437_v27 = vld [vmem:[%s679_s8 + $0x2] ss:$0 sm:$0xff] }
   0x2   :  { %v49_v2 = vsel %vm47_vm0, %v37_v1, 0  ;;  %476 = vmatprep.subr.bf16.mxu1 %v528_v0  ;;  %480 = vmatprep.mubr.msk.bf16.mxu1 %vm529_vm1, %v528_v0  ;;  %v36_v3 = vld [vmem:[%s676_s0] sm:$0xf]  ;;  %v521_v15 = vld [vmem:[%s678_s4 + $0x8] sm:$0xff]   ;;  %v445_v46 = vld [vmem:[%s679_s8 + $0x4] ss:$0 sm:$0xff] }
   0x3   :  { %471 = vmatpush3.bf16.msra.mxu0 %v49_v2  ;;  %v518_v4 = vld [vmem:[%s677_s3] sm:$0xff]   ;;  %v523_v25 = vld [vmem:[%s680_s5 + $0x8] sm:$0xff]  }
   0x4   :  { %484 = vmatprep.subr.bf16.mxu0 %v528_v0  ;;  %477 = vmatpush3.bf16.msra.mxu1 %v518_v4  ;;  %v520_v6 = vld [vmem:[%s678_s4] sm:$0xff]   ;;  %v525_v35 = vld [vmem:[%s681_s6 + $0x8] sm:$0xff]  }
   0x5   :  { %478 = vmatprep.subr.bf16.mxu1 %v528_v0  ;;  %v431_v7 = vld [vmem:[%s679_s8] ss:$0 sm:$0xff]  ;;  %v433_v17 = vld [vmem:[%s679_s8 + $0x1] ss:$0 sm:$0xff]  ;;  %v441_v37 = vld [vmem:[%s679_s8 + $0x3] ss:$0 sm:$0xff] }
   0x6   :  { %473 = vmatmul.mubr.msk.bf16.vlgmr.msra.gmra.mrb[0].mxu0 %vm43_vm2, %v36_v3  ;;  %v522_v16 = vld [vmem:[%s680_s5] sm:$0xff]   ;;  %v527_v45 = vld [vmem:[%s682_s7 + $0x8] sm:$0xff]  }
   0x7   :  { %488 = vmatprep.mubr.msk.bf16.mxu0 %vm529_vm1, %v528_v0  ;;  %485 = vmatpush3.bf16.msra.mxu0 %v520_v6  ;;  %v524_v26 = vld [vmem:[%s681_s6] sm:$0xff]  }
   0x8   :  { %479 = vmatpush3.bf16.msra.mxu1 %v519_v5  ;;  %486 = vmatprep.subr.bf16.mxu0 %v528_v0  ;;  %v526_v36 = vld [vmem:[%s682_s7] sm:$0xff]  }
   0x9   :  { %492 = vmatprep.subr.bf16.mxu1 %v528_v0  ;;  %v449_v54 = vld [vmem:[%s683_s9] ss:$0 sm:$0xff] }
   0xa   :  { %v424_v56 = vld [vmem:[%s684_s1] sm:$0xff] }
   0xb   :  { %487 = vmatpush3.bf16.msra.mxu0 %v521_v15 }
   0xc   :  { %500 = vmatprep.subr.bf16.mxu0 %v528_v0 }
  0xd9   :  { %v85_v8 = vpop.f32.mrb[0].mxu0 }
  0xda   :  { %v86_v9 = vadd.f32 %v431_v7, %v85_v8  ;;  %v474_v10 = vpop.f32.mrb[1].mxu0 }
  0xdb   :  { %v88_v11 = vpop.f32.mrb[2].mxu0 }
  0xdc   :  { %v91_v12 = vmax.f32 %v86_v9, 0.0  ;;  %v475_v13 = vpop.f32.mrb[3].mxu0 }
  0xde   :  { %v92_v14 = vpack.c.bf16 %v91_v12, %v91_v12 }
  0xe0   :  { %481 = vmatmul.mubr.msk.bf16.vlgmr.msra.gmra.mrb[0].mxu1 %vm114_vm3, %v92_v14 }
  0xe1   :  { %496 = vmatprep.mubr.msk.bf16.mxu1 %vm529_vm1, %v528_v0  ;;  %493 = vmatpush3.bf16.msra.mxu1 %v522_v16 }
  0xe2   :  { %494 = vmatprep.subr.bf16.mxu1 %v528_v0 }
  0xe5   :  { %495 = vmatpush3.bf16.msra.mxu1 %v523_v25 }
  0xe6   :  { %508 = vmatprep.subr.bf16.mxu1 %v528_v0 }
 0x1b3   :  { %v152_v18 = vpop.f32.mrb[0].mxu1 }
 0x1b4   :  { %v153_v19 = vadd.f32 %v433_v17, %v152_v18  ;;  %v482_v20 = vpop.f32.mrb[1].mxu1 }
 0x1b5   :  { %v155_v21 = vpop.f32.mrb[2].mxu1 }
 0x1b6   :  { %v158_v22 = vmax.f32 %v153_v19, 0.0  ;;  %v483_v23 = vpop.f32.mrb[3].mxu1 }
 0x1b8   :  { %v159_v24 = vpack.c.bf16 %v158_v22, %v158_v22 }
 0x1ba   :  { %489 = vmatmul.mubr.msk.bf16.vlgmr.msra.gmra.mrb[4].mxu0 %vm114_vm3, %v159_v24 }
 0x1bb   :  { %504 = vmatprep.mubr.msk.bf16.mxu0 %vm529_vm1, %v528_v0  ;;  %501 = vmatpush3.bf16.msra.mxu0 %v524_v26 }
 0x1bc   :  { %502 = vmatprep.subr.bf16.mxu0 %v528_v0 }
 0x1bf   :  { %503 = vmatpush3.bf16.msra.mxu0 %v525_v35 }
 0x28d   :  { %v218_v28 = vpop.f32.mrb[4].mxu0 }
 0x28e   :  { %v219_v29 = vadd.f32 %v437_v27, %v218_v28  ;;  %v490_v30 = vpop.f32.mrb[5].mxu0 }
 0x28f   :  { %v221_v31 = vpop.f32.mrb[6].mxu0 }
 0x290   :  { %v224_v32 = vmax.f32 %v219_v29, 0.0  ;;  %v491_v33 = vpop.f32.mrb[7].mxu0 }
 0x292   :  { %v225_v34 = vpack.c.bf16 %v224_v32, %v224_v32 }
 0x294   :  { %497 = vmatmul.mubr.msk.bf16.vlgmr.msra.gmra.mrb[4].mxu1 %vm114_vm3, %v225_v34 }
 0x295   :  { %512 = vmatprep.mubr.msk.bf16.mxu1 %vm529_vm1, %v528_v0  ;;  %509 = vmatpush3.bf16.msra.mxu1 %v526_v36 }
 0x296   :  { %510 = vmatprep.subr.bf16.mxu1 %v528_v0 }
 0x299   :  { %511 = vmatpush3.bf16.msra.mxu1 %v527_v45 }
 0x367   :  { %v284_v38 = vpop.f32.mrb[4].mxu1 }
 0x368   :  { %v285_v39 = vadd.f32 %v441_v37, %v284_v38  ;;  %v498_v40 = vpop.f32.mrb[5].mxu1 }
 0x369   :  { %v287_v41 = vpop.f32.mrb[6].mxu1 }
 0x36a   :  { %v290_v42 = vmax.f32 %v285_v39, 0.0  ;;  %v499_v43 = vpop.f32.mrb[7].mxu1 }
 0x36c   :  { %v291_v44 = vpack.c.bf16 %v290_v42, %v290_v42 }
 0x36e   :  { %505 = vmatmul.mubr.msk.bf16.vlgmr.msra.gmra.mrb[8].mxu0 %vm114_vm3, %v291_v44 }
 0x441   :  { %v350_v47 = vpop.f32.mrb[8].mxu0 }
 0x442   :  { %v351_v48 = vadd.f32 %v445_v46, %v350_v47  ;;  %v506_v49 = vpop.f32.mrb[9].mxu0 }
 0x443   :  { %v353_v50 = vpop.f32.mrb[10].mxu0 }
 0x444   :  { %v356_v51 = vmax.f32 %v351_v48, 0.0  ;;  %v507_v52 = vpop.f32.mrb[11].mxu0 }
 0x446   :  { %v357_v53 = vpack.c.bf16 %v356_v51, %v356_v51 }
 0x448   :  { %513 = vmatmul.mubr.msk.bf16.vlgmr.msra.gmra.mrb[8].mxu1 %vm114_vm3, %v357_v53 }
 0x51b   :  { %v418_v55 = vpop.f32.mrb[8].mxu1 }
 0x51c   :  { %v419_v57 = vadd.f32 %v449_v54, %v418_v55  ;;  %v514_v58 = vpop.f32.mrb[9].mxu1 }
 0x51d   :  { %v421_v59 = vpop.f32.mrb[10].mxu1 }
 0x51e   :  { %v425_v60 = vadd.f32 %v424_v56, %v419_v57  ;;  %v515_v61 = vpop.f32.mrb[11].mxu1 }
 0x520   :  { %426 = vst.msk [vmem:[%s685_s10] sm:$0xff] %vm43_vm2, %v425_v60 }

</bundles_post_ra>
